<compile_context>
chip_gen: v7x
topology: tpu7x:2x2x1
jax: 0.10.0
libtpu: 0.0.40
codegen_flags: <defaults>
</compile_context>

<pallas_src>
import jax
import jax.numpy as jnp
from jax.experimental import pallas as pl
from jax.experimental.pallas import tpu as pltpu


def _round_up(x, m):
    return ((x + m - 1) // m) * m


def _gemm_bias_relu_kernel(x_ref, w_ref, b_ref, o_ref):
    # x_ref: (tm, Kp) bf16   w_ref: (Kp, Cp) bf16   b_ref: (1, Cp) f32   o_ref: (tm, Cp) f32
    acc = jnp.dot(x_ref[...], w_ref[...], preferred_element_type=jnp.float32)
    acc = acc + b_ref[...]
    o_ref[...] = jnp.maximum(acc, 0.0).astype(o_ref.dtype)


def conv3x3_relu_pallas(x_nhwc, w_hwio, b, *, stride=1, pad=1, tm=256):
    """3x3 conv (stride, padding=1) + bias + ReLU via im2col + Pallas GEMM kernel."""
    N, H, W, Cin = x_nhwc.shape
    KH, KW, _, Cout = w_hwio.shape
    Ho = (H + 2 * pad - KH) // stride + 1
    Wo = (W + 2 * pad - KW) // stride + 1

    # TODO(synk): im2col patch extraction is data-movement glue kept in JAX; for large Cin
    # it should become an in-kernel (kh,kw) reduction axis to avoid the 9x HBM copy.
    xp = jnp.pad(x_nhwc, ((0, 0), (pad, pad), (pad, pad), (0, 0)))
    patches = []
    for kh in range(KH):
        for kw in range(KW):
            patches.append(
                xp[:, kh:kh + stride * (Ho - 1) + 1:stride,
                      kw:kw + stride * (Wo - 1) + 1:stride, :])
    xm = jnp.concatenate(patches, axis=-1).reshape(N * Ho * Wo, KH * KW * Cin)
    wm = w_hwio.reshape(KH * KW * Cin, Cout)   # (kh, kw, cin) ordering matches patches

    M, K = xm.shape
    # Layout-friendly padding: Cout -> multiple of 128 (lane-dense stores, full MXU lanes),
    # K -> multiple of 8 (weight sublane), M -> multiple of tm (replaces the old assert).
    Kp = _round_up(K, 8)
    Cp = _round_up(Cout, 128)
    grid_m = pl.cdiv(M, tm)
    Mp = grid_m * tm

    xm_p = jnp.pad(xm, ((0, Mp - M), (0, Kp - K))).astype(jnp.bfloat16)
    wm_p = jnp.pad(wm, ((0, Kp - K), (0, Cp - Cout))).astype(jnp.bfloat16)
    bm_p = jnp.pad(b.astype(jnp.float32), (0, Cp - Cout)).reshape(1, Cp)

    cost = pl.CostEstimate(
        flops=2 * Mp * Kp * Cp,
        transcendentals=0,
        bytes_accessed=xm_p.size * 2 + wm_p.size * 2 + bm_p.size * 4 + Mp * Cp * 4,
    )

    out = pl.pallas_call(
        _gemm_bias_relu_kernel,
        out_shape=jax.ShapeDtypeStruct((Mp, Cp), jnp.float32),
        grid=(grid_m,),
        in_specs=[
            pl.BlockSpec((tm, Kp), lambda i: (i, 0)),   # streamed activation tiles
            pl.BlockSpec((Kp, Cp), lambda i: (0, 0)),   # VMEM-resident weights
            pl.BlockSpec((1, Cp), lambda i: (0, 0)),    # VMEM-resident bias
        ],
        out_specs=pl.BlockSpec((tm, Cp), lambda i: (i, 0)),
        compiler_params=pltpu.CompilerParams(
            dimension_semantics=("parallel",),          # M tiles shard across v7x's 2 TCs
        ),
        cost_estimate=cost,
    )(xm_p, wm_p, bm_p)

    return out[:M, :Cout].reshape(N, Ho, Wo, Cout)


def _upsample2x_along(x, axis):
    """Exact PyTorch nn.Upsample(scale_factor=2, mode='bilinear', align_corners=False)
    along one axis: out[2k] = 0.25*x[k-1] + 0.75*x[k], out[2k+1] = 0.75*x[k] + 0.25*x[k+1],
    with edge-clamped neighbors."""
    L = x.shape[axis]

    def sl(start, stop):
        return jax.lax.slice_in_dim(x, start, stop, axis=axis)

    prev = jnp.concatenate([sl(0, 1), sl(0, L - 1)], axis=axis)    # x[max(k-1, 0)]
    nxt = jnp.concatenate([sl(1, L), sl(L - 1, L)], axis=axis)     # x[min(k+1, L-1)]
    even = 0.25 * prev + 0.75 * x
    odd = 0.75 * x + 0.25 * nxt
    out = jnp.stack([even, odd], axis=axis + 1)
    new_shape = list(x.shape)
    new_shape[axis] = 2 * L
    return out.reshape(new_shape)


def upsample2x_bilinear_nhwc(x_nhwc):
    # TODO(synk): bilinear x2 upsample is a memory-bound interleave/lerp; kept as JAX glue
    # rather than a dedicated Pallas kernel.
    x = _upsample2x_along(x_nhwc, 1)   # H
    x = _upsample2x_along(x, 2)        # W
    return x


def make_upsample_forward(x_nchw, params, stride=1):
    """Equivalent of _make_upsample_layer.forward on an NCHW input."""
    w1, b1, w2, b2 = params            # PyTorch layouts: w = (Cout, Cin, KH, KW), b = (Cout,)
    x = jnp.transpose(x_nchw, (0, 2, 3, 1))       # NCHW -> NHWC
    w1_hwio = jnp.transpose(w1, (2, 3, 1, 0))     # OIHW -> HWIO
    w2_hwio = jnp.transpose(w2, (2, 3, 1, 0))
    x = conv3x3_relu_pallas(x, w1_hwio, b1, stride=stride)
    x = upsample2x_bilinear_nhwc(x)
    x = conv3x3_relu_pallas(x, w2_hwio, b2, stride=stride)
    x = upsample2x_bilinear_nhwc(x)
    return jnp.transpose(x, (0, 3, 1, 2))         # NHWC -> NCHW


def reference_forward(x_nchw, params, stride=1):
    """Pure-JAX reference matching PyTorch semantics (f32, independent upsample impl)."""
    w1, b1, w2, b2 = params

    def conv_relu(x, w, b):
        y = jax.lax.conv_general_dilated(
            x, w, window_strides=(stride, stride), padding=((1, 1), (1, 1)),
            dimension_numbers=("NCHW", "OIHW", "NCHW"),
            precision=jax.lax.Precision.HIGHEST)
        return jnp.maximum(y + b[None, :, None, None], 0.0)

    def up(x):
        n, c, h, w = x.shape
        # half-pixel-center bilinear == PyTorch align_corners=False for x2 upsampling
        return jax.image.resize(x, (n, c, 2 * h, 2 * w), method="bilinear")

    x = conv_relu(x_nchw, w1, b1)
    x = up(x)
    x = conv_relu(x, w2, b2)
    x = up(x)
    return x


if __name__ == "__main__":
    key = jax.random.PRNGKey(0)
    k1, k2, k3, k4, k5 = jax.random.split(key, 5)

    N, Cin, Cout, H, W = 2, 4, 8, 16, 16   # inlayer=4, outlayer=8
    x = jax.random.normal(k1, (N, Cin, H, W), jnp.float32)
    # Deterministic synthetic parameters (same shapes as the nn.Conv2d layers).
    w1 = 0.1 * jax.random.normal(k2, (Cin, Cin, 3, 3), jnp.float32)
    b1 = 0.1 * jax.random.normal(k3, (Cin,), jnp.float32)
    w2 = 0.1 * jax.random.normal(k4, (Cout, Cin, 3, 3), jnp.float32)
    b2 = 0.1 * jax.random.normal(k5, (Cout,), jnp.float32)
    params = (w1, b1, w2, b2)

    fwd = jax.jit(make_upsample_forward)
    out = fwd(x, params)
    out = jax.block_until_ready(out)

    ref = reference_forward(x, params)
    assert out.shape == (N, Cout, 4 * H, 4 * W), out.shape
    # bf16 MXU operands with f32 accumulation -> ~1e-2-level agreement vs the f32 reference.
    max_err = float(jnp.max(jnp.abs(out - ref)))
    assert jnp.allclose(out, ref, atol=3e-2, rtol=3e-2), f"mismatch vs reference, max_err={max_err}"

    print("KERNEL_OK")
</pallas_src>

<mosaic_0001>
module attributes {stable_mosaic.version = 11 : i64} {
  func.func @_gemm_bias_relu_kernel(%arg0: i32, %arg1: memref<256x40xbf16, #tpu.memory_space<vmem>>, %arg2: memref<40x128xbf16, #tpu.memory_space<vmem>>, %arg3: memref<1x128xf32, #tpu.memory_space<vmem>>, %arg4: memref<256x128xf32, #tpu.memory_space<vmem>>) attributes {dimension_semantics = [#tpu.dimension_semantics<parallel>], iteration_bounds = array<i64: 2>, scalar_prefetch = 0 : i64, scratch_operands = 0 : i64, tpu.core_type = #tpu.core_type<tc>, window_params = [{transform_indices = @transform_0, window_bounds = array<i64: 256, 40>}, {pipeline_mode = #tpu.pipeline_mode<synchronous>, transform_indices = @transform_1, window_bounds = array<i64: 40, 128>}, {pipeline_mode = #tpu.pipeline_mode<synchronous>, transform_indices = @transform_2, window_bounds = array<i64: 1, 128>}, {transform_indices = @transform_3, window_bounds = array<i64: 256, 128>}]} {
    %c0 = arith.constant 0 : index
    %c0_0 = arith.constant 0 : index
    %0 = vector.load %arg1[%c0, %c0_0] : memref<256x40xbf16, #tpu.memory_space<vmem>>, vector<256x40xbf16>
    %c0_1 = arith.constant 0 : index
    %c0_2 = arith.constant 0 : index
    %1 = vector.load %arg2[%c0_1, %c0_2] : memref<40x128xbf16, #tpu.memory_space<vmem>>, vector<40x128xbf16>
    %cst = arith.constant dense<0.000000e+00> : vector<256x128xf32>
    %2 = tpu.matmul %0, %1, %cst {dimension_numbers = #tpu.dot_dimension_numbers<[1], [0], [0], [1], [0, 0, 1, 1], [], []>} : vector<256x40xbf16>, vector<40x128xbf16>, vector<256x128xf32> -> vector<256x128xf32>
    %c0_3 = arith.constant 0 : index
    %c0_4 = arith.constant 0 : index
    %3 = vector.load %arg3[%c0_3, %c0_4] : memref<1x128xf32, #tpu.memory_space<vmem>>, vector<1x128xf32>
    %4 = vector.broadcast %3 : vector<1x128xf32> to vector<256x128xf32>
    %5 = arith.addf %2, %4 : vector<256x128xf32>
    %cst_5 = arith.constant 0.000000e+00 : f32
    %6 = vector.broadcast %cst_5 : f32 to vector<256x128xf32>
    %7 = arith.maximumf %5, %6 : vector<256x128xf32>
    %c0_6 = arith.constant 0 : index
    %c0_7 = arith.constant 0 : index
    %8 = vector.load %arg4[%c0_6, %c0_7] : memref<256x128xf32, #tpu.memory_space<vmem>>, vector<256x128xf32>
    tpu.vector_store %arg4[%c0_6, %c0_7], %7 {strides = array<i32>} : memref<256x128xf32, #tpu.memory_space<vmem>>, vector<256x128xf32>,
    return
  }
  func.func @transform_0(%arg0: i32) -> (i32, i32) {
    %c0_i32 = arith.constant 0 : i32
    %c0_i32_0 = arith.constant 0 : i32
    return %arg0, %c0_i32 : i32, i32
  }
  func.func @transform_1(%arg0: i32) -> (i32, i32) {
    %c0_i32 = arith.constant 0 : i32
    %c0_i32_0 = arith.constant 0 : i32
    %c0_i32_1 = arith.constant 0 : i32
    return %c0_i32, %c0_i32_0 : i32, i32
  }
  func.func @transform_2(%arg0: i32) -> (i32, i32) {
    %c0_i32 = arith.constant 0 : i32
    %c0_i32_0 = arith.constant 0 : i32
    %c0_i32_1 = arith.constant 0 : i32
    return %c0_i32, %c0_i32_0 : i32, i32
  }
  func.func @transform_3(%arg0: i32) -> (i32, i32) {
    %c0_i32 = arith.constant 0 : i32
    %c0_i32_0 = arith.constant 0 : i32
    return %arg0, %c0_i32 : i32, i32
  }
}

module attributes {stable_mosaic.version = 11 : i64} {
  func.func @_gemm_bias_relu_kernel(%arg0: i32, %arg1: memref<256x40xbf16, #tpu.memory_space<vmem>>, %arg2: memref<40x128xbf16, #tpu.memory_space<vmem>>, %arg3: memref<1x128xf32, #tpu.memory_space<vmem>>, %arg4: memref<256x128xf32, #tpu.memory_space<vmem>>) attributes {dimension_semantics = [#tpu.dimension_semantics<parallel>], iteration_bounds = array<i64: 8>, scalar_prefetch = 0 : i64, scratch_operands = 0 : i64, tpu.core_type = #tpu.core_type<tc>, window_params = [{transform_indices = @transform_0, window_bounds = array<i64: 256, 40>}, {pipeline_mode = #tpu.pipeline_mode<synchronous>, transform_indices = @transform_1, window_bounds = array<i64: 40, 128>}, {pipeline_mode = #tpu.pipeline_mode<synchronous>, transform_indices = @transform_2, window_bounds = array<i64: 1, 128>}, {transform_indices = @transform_3, window_bounds = array<i64: 256, 128>}]} {
    %c0 = arith.constant 0 : index
    %c0_0 = arith.constant 0 : index
    %0 = vector.load %arg1[%c0, %c0_0] : memref<256x40xbf16, #tpu.memory_space<vmem>>, vector<256x40xbf16>
    %c0_1 = arith.constant 0 : index
    %c0_2 = arith.constant 0 : index
    %1 = vector.load %arg2[%c0_1, %c0_2] : memref<40x128xbf16, #tpu.memory_space<vmem>>, vector<40x128xbf16>
    %cst = arith.constant dense<0.000000e+00> : vector<256x128xf32>
    %2 = tpu.matmul %0, %1, %cst {dimension_numbers = #tpu.dot_dimension_numbers<[1], [0], [0], [1], [0, 0, 1, 1], [], []>} : vector<256x40xbf16>, vector<40x128xbf16>, vector<256x128xf32> -> vector<256x128xf32>
    %c0_3 = arith.constant 0 : index
    %c0_4 = arith.constant 0 : index
    %3 = vector.load %arg3[%c0_3, %c0_4] : memref<1x128xf32, #tpu.memory_space<vmem>>, vector<1x128xf32>
    %4 = vector.broadcast %3 : vector<1x128xf32> to vector<256x128xf32>
    %5 = arith.addf %2, %4 : vector<256x128xf32>
    %cst_5 = arith.constant 0.000000e+00 : f32
    %6 = vector.broadcast %cst_5 : f32 to vector<256x128xf32>
    %7 = arith.maximumf %5, %6 : vector<256x128xf32>
    %c0_6 = arith.constant 0 : index
    %c0_7 = arith.constant 0 : index
    %8 = vector.load %arg4[%c0_6, %c0_7] : memref<256x128xf32, #tpu.memory_space<vmem>>, vector<256x128xf32>
    tpu.vector_store %arg4[%c0_6, %c0_7], %7 {strides = array<i32>} : memref<256x128xf32, #tpu.memory_space<vmem>>, vector<256x128xf32>,
    return
  }
  func.func @transform_0(%arg0: i32) -> (i32, i32) {
    %c0_i32 = arith.constant 0 : i32
    %c0_i32_0 = arith.constant 0 : i32
    return %arg0, %c0_i32 : i32, i32
  }
  func.func @transform_1(%arg0: i32) -> (i32, i32) {
    %c0_i32 = arith.constant 0 : i32
    %c0_i32_0 = arith.constant 0 : i32
    %c0_i32_1 = arith.constant 0 : i32
    return %c0_i32, %c0_i32_0 : i32, i32
  }
  func.func @transform_2(%arg0: i32) -> (i32, i32) {
    %c0_i32 = arith.constant 0 : i32
    %c0_i32_0 = arith.constant 0 : i32
    %c0_i32_1 = arith.constant 0 : i32
    return %c0_i32, %c0_i32_0 : i32, i32
  }
  func.func @transform_3(%arg0: i32) -> (i32, i32) {
    %c0_i32 = arith.constant 0 : i32
    %c0_i32_0 = arith.constant 0 : i32
    return %arg0, %c0_i32 : i32, i32
  }
}

</mosaic_0001>

<bundles_post_ra>
// kernel: make_upsample_forward.2
= control target key start
LH: loop header
LB: loop body
LE: loop exit
PB: predicated region body
PF: predicated region fallthrough
CT: control target
= control target key end

     0   :  { %s815_s12 = smov 0   ;;  %s950_s0 = inlined_call_operand.vmem [shape: bf16[512,40], index: 0, kind: input, shape index: {}]   ;;  %s951_s1 = inlined_call_operand.vmem [shape: bf16[40,128], index: 1, kind: input, shape index: {}]   ;;  %s952_s2 = inlined_call_operand.vmem [shape: f32[1,128], index: 2, kind: input, shape index: {}]   ;;  %s953_s3 = inlined_call_operand.vmem [shape: f32[512,128], index: 3, kind: output, shape index: {}]  }
   0x1 LB: > { %s648_s13 = sadd.s32 4294967295, %s793_s12   ;;  %p652_p0 = scmp.ge.s32.totalorder %s793_s12, 1  ;;  %s793_s12 = sphi %s815_s12, %s13_s12  }
   0x2   : > { %p138_p1 = scmp.lt.s32.totalorder %s793_s12, 3 }
   0x4   : > { %p139_p2 = pnand %p652_p0, %p138_p1 }
   0x5   : > { %v768_v0 = vld [vmem:[%s951_s1] sm:$0xff] (!%p139_p2)   ;;  %v769_v1 = vld [vmem:[%s951_s1 + $0x8] sm:$0xff] (!%p139_p2)   ;;  %s653_s18 = sshll.u32 (!%p139_p2), %s648_s13, 5  ;;  %v770_v2 = vld [vmem:[%s951_s1 + $0x10] ss:$0 sps:$4 sm:$0xff] (!%p139_p2)   ;;  %vm363_vm0 = vcmask (!%p139_p2), 1043456  }
   0x6   : > { %142 = sbr.rel (%p139_p2) target bundleno = 263 (0x107), region = 32  ;;  %714 = vmatprep.subr.bf16.mxu0 (!%p139_p2), %v768_v0  ;;  %752 = vmatprep.subr.bf16.mxu1 (!%p139_p2), %v768_v0  ;;  %p163_p3 = scmp.lt.s32.totalorder (!%p139_p2), %s653_s18, 63  ;;  %vm314_vm1 = vcmask (!%p139_p2), 326656   ;;  %v365_v3 = vsel (!%p139_p2), %vm363_vm0, %v770_v2, 0  ;;  %v875_v20 = vld [vmem:[%s952_s2] ss:$0 sm:$0xff] (!%p139_p2) }
   0x7   : > { %715 = vmatpush3.bf16.msra.mxu0 (!%p139_p2), %v768_v0  ;;  %755 = vmatpush3.bf16.msra.mxu1 (!%p139_p2), %v768_v0 }
   0x8   : > { %716 = vmatprep.subr.bf16.mxu0 (!%p139_p2), %v769_v1  ;;  %753 = vmatprep.subr.bf16.mxu1 (!%p139_p2), %v769_v1 }
   0xb   : > { %717 = vmatpush3.bf16.msra.mxu0 (!%p139_p2), %v769_v1  ;;  %756 = vmatpush3.bf16.msra.mxu1 (!%p139_p2), %v769_v1 }
   0xc   : > { %758 = vmatprep.subr.msk.bf16.mxu0 (!%p139_p2), %vm363_vm0, %v770_v2  ;;  %759 = vmatprep.subr.msk.bf16.mxu1 (!%p139_p2), %vm363_vm0, %v770_v2 }
   0xd   : > { %s955_s18 = smov (!%p163_p3, %s653_s18), 63 }
   0xe   : > { %s654_s21 = sshll.u32 %s955_s18, 2  ;;  %s656_s27 = sshll.u32 %s955_s18, 3 }
   0xf   : > { %s838_s24 = scalar_lea.vmem %s950_s0, %s654_s21  ;;  %719 = vmatpush3.bf16.msra.mxu0 %v365_v3  ;;  %757 = vmatpush3.bf16.msra.mxu1 %v365_v3  ;;  %s883_s30 = scalar_lea.vmem %s953_s3, %s656_s27 }
  0x10   : > { %v771_v4 = vld [vmem:[%s838_s24] sm:$0xff]   ;;  %v773_v6 = vld [vmem:[%s838_s24 + $0x8] sm:$0xff]   ;;  %v775_v8 = vld [vmem:[%s838_s24 + $0x10] sm:$0xff]  }
  0x11   : > { %v772_v5 = vld [vmem:[%s838_s24 + $0x40] sm:$0xff]   ;;  %720 = vmatprep.mubr.msk.bf16.mxu0 %vm314_vm1, %v771_v4  ;;  %v774_v7 = vld [vmem:[%s838_s24 + $0x48] sm:$0xff]   ;;  %v776_v9 = vld [vmem:[%s838_s24 + $0x50] sm:$0xff]  }
  0x12   : > { %736 = vmatprep.mubr.msk.bf16.mxu1 %vm314_vm1, %v772_v5  ;;  %721 = vmatmul.mubr.msk.bf16.vlgmr.msra.gmra.mrb[0].mxu0 %vm314_vm1, %v773_v6  ;;  %v777_v10 = vld [vmem:[%s838_s24 + $0x18] sm:$0xff]   ;;  %v779_v12 = vld [vmem:[%s838_s24 + $0x20] sm:$0xff]   ;;  %v781_v14 = vld [vmem:[%s838_s24 + $0x28] sm:$0xff]  }
  0x13   : > { %737 = vmatmul.mubr.msk.bf16.vlgmr.msra.gmra.mrb[0].mxu1 %vm314_vm1, %v774_v7  ;;  %724 = vmatprep.mubr.msk.bf16.mxu0 %vm314_vm1, %v775_v8  ;;  %v778_v11 = vld [vmem:[%s838_s24 + $0x58] sm:$0xff]   ;;  %v780_v13 = vld [vmem:[%s838_s24 + $0x60] sm:$0xff]   ;;  %v782_v15 = vld [vmem:[%s838_s24 + $0x68] sm:$0xff]  }
  0x14   : > { %740 = vmatprep.mubr.msk.bf16.mxu1 %vm314_vm1, %v776_v9  ;;  %v783_v16 = vld [vmem:[%s838_s24 + $0x30] sm:$0xff]   ;;  %v785_v18 = vld [vmem:[%s838_s24 + $0x38] sm:$0xff]  }
  0x15   : > { %v784_v17 = vld [vmem:[%s838_s24 + $0x70] sm:$0xff]   ;;  %v786_v19 = vld [vmem:[%s838_s24 + $0x78] sm:$0xff]  }
  0x1a   : > { %725 = vmatmul.mubr.msk.bf16.gmra.mrb[4].mxu0 %vm314_vm1, %v777_v10 }
  0x1b   : > { %741 = vmatmul.mubr.msk.bf16.gmra.mrb[4].mxu1 %vm314_vm1, %v778_v11  ;;  %728 = vmatprep.mubr.msk.bf16.mxu0 %vm314_vm1, %v779_v12 }
  0x1c   : > { %744 = vmatprep.mubr.msk.bf16.mxu1 %vm314_vm1, %v780_v13 }
  0x22   : > { %729 = vmatmul.mubr.msk.bf16.gmra.mrb[8].mxu0 %vm314_vm1, %v781_v14 }
  0x23   : > { %745 = vmatmul.mubr.msk.bf16.gmra.mrb[8].mxu1 %vm314_vm1, %v782_v15  ;;  %732 = vmatprep.mubr.msk.bf16.mxu0 %vm314_vm1, %v783_v16 }
  0x24   : > { %748 = vmatprep.mubr.msk.bf16.mxu1 %vm314_vm1, %v784_v17 }
  0x2a   : > { %733 = vmatmul.mubr.msk.bf16.gmra.mrb[12].mxu0 %vm314_vm1, %v785_v18 }
  0x2b   : > { %749 = vmatmul.mubr.msk.bf16.gmra.mrb[12].mxu1 %vm314_vm1, %v786_v19 }
  0xe5   : > { %v722_v21 = vpop.f32.mrb[0].mxu0 }
  0xe6   : > { %v738_v22 = vpop.f32.mrb[0].mxu1  ;;  %v410_v23 = vadd.f32 %v722_v21, %v875_v20  ;;  %v401_v25 = vpop.f32.mrb[1].mxu0 }
  0xe7   : > { %v474_v24 = vadd.f32 %v738_v22, %v875_v20  ;;  %v465_v26 = vpop.f32.mrb[1].mxu1  ;;  %v402_v27 = vadd.f32 %v875_v20, %v401_v25  ;;  %v723_v29 = vpop.f32.mrb[2].mxu0 }
  0xe8   : > { %v466_v28 = vadd.f32 %v875_v20, %v465_v26  ;;  %v739_v30 = vpop.f32.mrb[2].mxu1  ;;  %v530_v31 = vmax.f32 %v410_v23, 0.0  ;;  %v413_v33 = vadd.f32 %v723_v29, %v875_v20  ;;  %v404_v35 = vpop.f32.mrb[3].mxu0 }
  0xe9   : > { %v546_v32 = vmax.f32 %v474_v24, 0.0  ;;  %v477_v34 = vadd.f32 %v739_v30, %v875_v20  ;;  %v468_v36 = vpop.f32.mrb[3].mxu1  ;;  %v528_v37 = vmax.f32 %v402_v27, 0.0  ;;  %v405_v39 = vadd.f32 %v875_v20, %v404_v35 }
  0xea   : > { %v544_v38 = vmax.f32 %v466_v28, 0.0  ;;  %v469_v40 = vadd.f32 %v875_v20, %v468_v36  ;;  %562 = vst [vmem:[%s883_s30 + $0x10] sm:$0xff] %v530_v31  ;;  %v531_v41 = vmax.f32 %v413_v33, 0.0 }
  0xeb   : > { %578 = vst [vmem:[%s883_s30 + $0x90] sm:$0xff] %v546_v32  ;;  %v547_v42 = vmax.f32 %v477_v34, 0.0  ;;  %560 = vst [vmem:[%s883_s30] sm:$0xff] %v528_v37  ;;  %v529_v43 = vmax.f32 %v405_v39, 0.0 }
  0xec   : > { %576 = vst [vmem:[%s883_s30 + $0x80] sm:$0xff] %v544_v38  ;;  %v545_v44 = vmax.f32 %v469_v40, 0.0  ;;  %563 = vst [vmem:[%s883_s30 + $0x18] sm:$0xff] %v531_v41 }
  0xed   : > { %579 = vst [vmem:[%s883_s30 + $0x98] sm:$0xff] %v547_v42  ;;  %561 = vst [vmem:[%s883_s30 + $0x8] sm:$0xff] %v529_v43  ;;  %v726_v45 = vpop.f32.mrb[4].mxu0 }
  0xee   : > { %577 = vst [vmem:[%s883_s30 + $0x88] sm:$0xff] %v545_v44  ;;  %v742_v46 = vpop.f32.mrb[4].mxu1  ;;  %v426_v47 = vadd.f32 %v726_v45, %v875_v20  ;;  %v417_v49 = vpop.f32.mrb[5].mxu0 }
  0xef   : > { %v490_v48 = vadd.f32 %v742_v46, %v875_v20  ;;  %v481_v50 = vpop.f32.mrb[5].mxu1  ;;  %v418_v51 = vadd.f32 %v875_v20, %v417_v49  ;;  %v727_v53 = vpop.f32.mrb[6].mxu0 }
  0xf0   : > { %v482_v52 = vadd.f32 %v875_v20, %v481_v50  ;;  %v743_v54 = vpop.f32.mrb[6].mxu1  ;;  %v534_v55 = vmax.f32 %v426_v47, 0.0  ;;  %v429_v57 = vadd.f32 %v727_v53, %v875_v20  ;;  %v420_v59 = vpop.f32.mrb[7].mxu0 }
  0xf1   : > { %v550_v56 = vmax.f32 %v490_v48, 0.0  ;;  %v493_v58 = vadd.f32 %v743_v54, %v875_v20  ;;  %v484_v60 = vpop.f32.mrb[7].mxu1  ;;  %v532_v61 = vmax.f32 %v418_v51, 0.0  ;;  %v421_v63 = vadd.f32 %v875_v20, %v420_v59 }
  0xf2   : > { %v548_v62 = vmax.f32 %v482_v52, 0.0  ;;  %v485_v0 = vadd.f32 %v875_v20, %v484_v60  ;;  %566 = vst [vmem:[%s883_s30 + $0x30] sm:$0xff] %v534_v55  ;;  %v535_v1 = vmax.f32 %v429_v57, 0.0 }
  0xf3   : > { %582 = vst [vmem:[%s883_s30 + $0xb0] sm:$0xff] %v550_v56  ;;  %v551_v2 = vmax.f32 %v493_v58, 0.0  ;;  %564 = vst [vmem:[%s883_s30 + $0x20] sm:$0xff] %v532_v61  ;;  %v533_v3 = vmax.f32 %v421_v63, 0.0 }
  0xf4   : > { %580 = vst [vmem:[%s883_s30 + $0xa0] sm:$0xff] %v548_v62  ;;  %v549_v4 = vmax.f32 %v485_v0, 0.0  ;;  %567 = vst [vmem:[%s883_s30 + $0x38] sm:$0xff] %v535_v1 }
  0xf5   : > { %583 = vst [vmem:[%s883_s30 + $0xb8] sm:$0xff] %v551_v2  ;;  %565 = vst [vmem:[%s883_s30 + $0x28] sm:$0xff] %v533_v3  ;;  %v730_v5 = vpop.f32.mrb[8].mxu0 }
  0xf6   : > { %581 = vst [vmem:[%s883_s30 + $0xa8] sm:$0xff] %v549_v4  ;;  %v746_v6 = vpop.f32.mrb[8].mxu1  ;;  %v442_v7 = vadd.f32 %v730_v5, %v875_v20  ;;  %v433_v9 = vpop.f32.mrb[9].mxu0 }
  0xf7   : > { %v506_v8 = vadd.f32 %v746_v6, %v875_v20  ;;  %v497_v10 = vpop.f32.mrb[9].mxu1  ;;  %v434_v11 = vadd.f32 %v875_v20, %v433_v9  ;;  %v731_v13 = vpop.f32.mrb[10].mxu0 }
  0xf8   : > { %v498_v12 = vadd.f32 %v875_v20, %v497_v10  ;;  %v747_v14 = vpop.f32.mrb[10].mxu1  ;;  %v538_v15 = vmax.f32 %v442_v7, 0.0  ;;  %v445_v17 = vadd.f32 %v731_v13, %v875_v20  ;;  %v436_v19 = vpop.f32.mrb[11].mxu0 }
  0xf9   : > { %v554_v16 = vmax.f32 %v506_v8, 0.0  ;;  %v509_v18 = vadd.f32 %v747_v14, %v875_v20  ;;  %v500_v21 = vpop.f32.mrb[11].mxu1  ;;  %v536_v22 = vmax.f32 %v434_v11, 0.0  ;;  %v437_v24 = vadd.f32 %v875_v20, %v436_v19 }
  0xfa   : > { %v552_v23 = vmax.f32 %v498_v12, 0.0  ;;  %v501_v25 = vadd.f32 %v875_v20, %v500_v21  ;;  %570 = vst [vmem:[%s883_s30 + $0x50] sm:$0xff] %v538_v15  ;;  %v539_v26 = vmax.f32 %v445_v17, 0.0 }
  0xfb   : > { %586 = vst [vmem:[%s883_s30 + $0xd0] sm:$0xff] %v554_v16  ;;  %v555_v27 = vmax.f32 %v509_v18, 0.0  ;;  %568 = vst [vmem:[%s883_s30 + $0x40] sm:$0xff] %v536_v22  ;;  %v537_v28 = vmax.f32 %v437_v24, 0.0 }
  0xfc   : > { %584 = vst [vmem:[%s883_s30 + $0xc0] sm:$0xff] %v552_v23  ;;  %v553_v29 = vmax.f32 %v501_v25, 0.0  ;;  %571 = vst [vmem:[%s883_s30 + $0x58] sm:$0xff] %v539_v26 }
  0xfd   : > { %587 = vst [vmem:[%s883_s30 + $0xd8] sm:$0xff] %v555_v27  ;;  %569 = vst [vmem:[%s883_s30 + $0x48] sm:$0xff] %v537_v28  ;;  %v734_v30 = vpop.f32.mrb[12].mxu0 }
  0xfe   : > { %585 = vst [vmem:[%s883_s30 + $0xc8] sm:$0xff] %v553_v29  ;;  %v750_v31 = vpop.f32.mrb[12].mxu1  ;;  %v458_v32 = vadd.f32 %v734_v30, %v875_v20  ;;  %v449_v34 = vpop.f32.mrb[13].mxu0 }
  0xff   : > { %v522_v33 = vadd.f32 %v750_v31, %v875_v20  ;;  %v513_v35 = vpop.f32.mrb[13].mxu1  ;;  %v450_v36 = vadd.f32 %v875_v20, %v449_v34  ;;  %v735_v38 = vpop.f32.mrb[14].mxu0 }
 0x100   : > { %v514_v37 = vadd.f32 %v875_v20, %v513_v35  ;;  %v751_v39 = vpop.f32.mrb[14].mxu1  ;;  %v542_v40 = vmax.f32 %v458_v32, 0.0  ;;  %v461_v42 = vadd.f32 %v735_v38, %v875_v20  ;;  %v452_v44 = vpop.f32.mrb[15].mxu0 }
 0x101   : > { %v558_v41 = vmax.f32 %v522_v33, 0.0  ;;  %v525_v43 = vadd.f32 %v751_v39, %v875_v20  ;;  %v516_v45 = vpop.f32.mrb[15].mxu1  ;;  %v540_v46 = vmax.f32 %v450_v36, 0.0  ;;  %v453_v48 = vadd.f32 %v875_v20, %v452_v44 }
 0x102   : > { %v556_v47 = vmax.f32 %v514_v37, 0.0  ;;  %v517_v49 = vadd.f32 %v875_v20, %v516_v45  ;;  %574 = vst [vmem:[%s883_s30 + $0x70] sm:$0xff] %v542_v40  ;;  %v543_v50 = vmax.f32 %v461_v42, 0.0 }
 0x103   : > { %590 = vst [vmem:[%s883_s30 + $0xf0] sm:$0xff] %v558_v41  ;;  %v559_v51 = vmax.f32 %v525_v43, 0.0  ;;  %572 = vst [vmem:[%s883_s30 + $0x60] sm:$0xff] %v540_v46  ;;  %v541_v52 = vmax.f32 %v453_v48, 0.0 }
 0x104   : > { %588 = vst [vmem:[%s883_s30 + $0xe0] sm:$0xff] %v556_v47  ;;  %v557_v53 = vmax.f32 %v517_v49, 0.0  ;;  %575 = vst [vmem:[%s883_s30 + $0x78] sm:$0xff] %v543_v50 }
 0x105   : > { %591 = vst [vmem:[%s883_s30 + $0xf8] sm:$0xff] %v559_v51  ;;  %573 = vst [vmem:[%s883_s30 + $0x68] sm:$0xff] %v541_v52 }
 0x106   : > { %589 = vst [vmem:[%s883_s30 + $0xe8] sm:$0xff] %v557_v53 }
 0x107 PF: > { %s13_s12 = sadd.s32 1, %s793_s12  }
 0x108   : > { %p10_p4 = scmp.ge.s32.totalorder %s13_s12, 4  }
 0x10a   :  { %12 = sbr.rel (!%p10_p4) target bundleno = 1 (0x1), region = 62 }

// kernel: make_upsample_forward.3
= control target key start
LH: loop header
LB: loop body
LE: loop exit
PB: predicated region body
PF: predicated region fallthrough
CT: control target
= control target key end

     0   :  { %s815_s12 = smov 0   ;;  %s950_s0 = inlined_call_operand.vmem [shape: bf16[2048,40], index: 0, kind: input, shape index: {}]   ;;  %s951_s1 = inlined_call_operand.vmem [shape: bf16[40,128], index: 1, kind: input, shape index: {}]   ;;  %s952_s2 = inlined_call_operand.vmem [shape: f32[1,128], index: 2, kind: input, shape index: {}]   ;;  %s953_s3 = inlined_call_operand.vmem [shape: f32[2048,128], index: 3, kind: output, shape index: {}]  }
   0x1 LB: > { %s648_s13 = sadd.s32 4294967295, %s793_s12   ;;  %p652_p0 = scmp.ge.s32.totalorder %s793_s12, 1  ;;  %s793_s12 = sphi %s815_s12, %s13_s12  }
   0x2   : > { %p138_p1 = scmp.lt.s32.totalorder %s793_s12, 9 }
   0x4   : > { %p139_p2 = pnand %p652_p0, %p138_p1 }
   0x5   : > { %v768_v0 = vld [vmem:[%s951_s1] sm:$0xff] (!%p139_p2)   ;;  %v769_v1 = vld [vmem:[%s951_s1 + $0x8] sm:$0xff] (!%p139_p2)   ;;  %s653_s18 = sshll.u32 (!%p139_p2), %s648_s13, 5  ;;  %v770_v2 = vld [vmem:[%s951_s1 + $0x10] ss:$0 sps:$4 sm:$0xff] (!%p139_p2)   ;;  %vm363_vm0 = vcmask (!%p139_p2), 1043456  }
   0x6   : > { %142 = sbr.rel (%p139_p2) target bundleno = 263 (0x107), region = 32  ;;  %714 = vmatprep.subr.bf16.mxu0 (!%p139_p2), %v768_v0  ;;  %752 = vmatprep.subr.bf16.mxu1 (!%p139_p2), %v768_v0  ;;  %p163_p3 = scmp.lt.s32.totalorder (!%p139_p2), %s653_s18, 255  ;;  %vm314_vm1 = vcmask (!%p139_p2), 326656   ;;  %v365_v3 = vsel (!%p139_p2), %vm363_vm0, %v770_v2, 0  ;;  %v875_v20 = vld [vmem:[%s952_s2] ss:$0 sm:$0xff] (!%p139_p2) }
   0x7   : > { %715 = vmatpush3.bf16.msra.mxu0 (!%p139_p2), %v768_v0  ;;  %755 = vmatpush3.bf16.msra.mxu1 (!%p139_p2), %v768_v0 }
   0x8   : > { %716 = vmatprep.subr.bf16.mxu0 (!%p139_p2), %v769_v1  ;;  %753 = vmatprep.subr.bf16.mxu1 (!%p139_p2), %v769_v1 }
   0xb   : > { %717 = vmatpush3.bf16.msra.mxu0 (!%p139_p2), %v769_v1  ;;  %756 = vmatpush3.bf16.msra.mxu1 (!%p139_p2), %v769_v1 }
   0xc   : > { %758 = vmatprep.subr.msk.bf16.mxu0 (!%p139_p2), %vm363_vm0, %v770_v2  ;;  %759 = vmatprep.subr.msk.bf16.mxu1 (!%p139_p2), %vm363_vm0, %v770_v2 }
   0xd   : > { %s955_s18 = smov (!%p163_p3, %s653_s18), 255 }
   0xe   : > { %s654_s21 = sshll.u32 %s955_s18, 2  ;;  %s656_s27 = sshll.u32 %s955_s18, 3 }
   0xf   : > { %s838_s24 = scalar_lea.vmem %s950_s0, %s654_s21  ;;  %719 = vmatpush3.bf16.msra.mxu0 %v365_v3  ;;  %757 = vmatpush3.bf16.msra.mxu1 %v365_v3  ;;  %s883_s30 = scalar_lea.vmem %s953_s3, %s656_s27 }
  0x10   : > { %v771_v4 = vld [vmem:[%s838_s24] sm:$0xff]   ;;  %v773_v6 = vld [vmem:[%s838_s24 + $0x8] sm:$0xff]   ;;  %v775_v8 = vld [vmem:[%s838_s24 + $0x10] sm:$0xff]  }
  0x11   : > { %v772_v5 = vld [vmem:[%s838_s24 + $0x40] sm:$0xff]   ;;  %720 = vmatprep.mubr.msk.bf16.mxu0 %vm314_vm1, %v771_v4  ;;  %v774_v7 = vld [vmem:[%s838_s24 + $0x48] sm:$0xff]   ;;  %v776_v9 = vld [vmem:[%s838_s24 + $0x50] sm:$0xff]  }
  0x12   : > { %736 = vmatprep.mubr.msk.bf16.mxu1 %vm314_vm1, %v772_v5  ;;  %721 = vmatmul.mubr.msk.bf16.vlgmr.msra.gmra.mrb[0].mxu0 %vm314_vm1, %v773_v6  ;;  %v777_v10 = vld [vmem:[%s838_s24 + $0x18] sm:$0xff]   ;;  %v779_v12 = vld [vmem:[%s838_s24 + $0x20] sm:$0xff]   ;;  %v781_v14 = vld [vmem:[%s838_s24 + $0x28] sm:$0xff]  }
  0x13   : > { %737 = vmatmul.mubr.msk.bf16.vlgmr.msra.gmra.mrb[0].mxu1 %vm314_vm1, %v774_v7  ;;  %724 = vmatprep.mubr.msk.bf16.mxu0 %vm314_vm1, %v775_v8  ;;  %v778_v11 = vld [vmem:[%s838_s24 + $0x58] sm:$0xff]   ;;  %v780_v13 = vld [vmem:[%s838_s24 + $0x60] sm:$0xff]   ;;  %v782_v15 = vld [vmem:[%s838_s24 + $0x68] sm:$0xff]  }
  0x14   : > { %740 = vmatprep.mubr.msk.bf16.mxu1 %vm314_vm1, %v776_v9  ;;  %v783_v16 = vld [vmem:[%s838_s24 + $0x30] sm:$0xff]   ;;  %v785_v18 = vld [vmem:[%s838_s24 + $0x38] sm:$0xff]  }
  0x15   : > { %v784_v17 = vld [vmem:[%s838_s24 + $0x70] sm:$0xff]   ;;  %v786_v19 = vld [vmem:[%s838_s24 + $0x78] sm:$0xff]  }
  0x1a   : > { %725 = vmatmul.mubr.msk.bf16.gmra.mrb[4].mxu0 %vm314_vm1, %v777_v10 }
  0x1b   : > { %741 = vmatmul.mubr.msk.bf16.gmra.mrb[4].mxu1 %vm314_vm1, %v778_v11  ;;  %728 = vmatprep.mubr.msk.bf16.mxu0 %vm314_vm1, %v779_v12 }
  0x1c   : > { %744 = vmatprep.mubr.msk.bf16.mxu1 %vm314_vm1, %v780_v13 }
  0x22   : > { %729 = vmatmul.mubr.msk.bf16.gmra.mrb[8].mxu0 %vm314_vm1, %v781_v14 }
  0x23   : > { %745 = vmatmul.mubr.msk.bf16.gmra.mrb[8].mxu1 %vm314_vm1, %v782_v15  ;;  %732 = vmatprep.mubr.msk.bf16.mxu0 %vm314_vm1, %v783_v16 }
  0x24   : > { %748 = vmatprep.mubr.msk.bf16.mxu1 %vm314_vm1, %v784_v17 }
  0x2a   : > { %733 = vmatmul.mubr.msk.bf16.gmra.mrb[12].mxu0 %vm314_vm1, %v785_v18 }
  0x2b   : > { %749 = vmatmul.mubr.msk.bf16.gmra.mrb[12].mxu1 %vm314_vm1, %v786_v19 }
  0xe5   : > { %v722_v21 = vpop.f32.mrb[0].mxu0 }
  0xe6   : > { %v738_v22 = vpop.f32.mrb[0].mxu1  ;;  %v410_v23 = vadd.f32 %v722_v21, %v875_v20  ;;  %v401_v25 = vpop.f32.mrb[1].mxu0 }
  0xe7   : > { %v474_v24 = vadd.f32 %v738_v22, %v875_v20  ;;  %v465_v26 = vpop.f32.mrb[1].mxu1  ;;  %v402_v27 = vadd.f32 %v875_v20, %v401_v25  ;;  %v723_v29 = vpop.f32.mrb[2].mxu0 }
  0xe8   : > { %v466_v28 = vadd.f32 %v875_v20, %v465_v26  ;;  %v739_v30 = vpop.f32.mrb[2].mxu1  ;;  %v530_v31 = vmax.f32 %v410_v23, 0.0  ;;  %v413_v33 = vadd.f32 %v723_v29, %v875_v20  ;;  %v404_v35 = vpop.f32.mrb[3].mxu0 }
  0xe9   : > { %v546_v32 = vmax.f32 %v474_v24, 0.0  ;;  %v477_v34 = vadd.f32 %v739_v30, %v875_v20  ;;  %v468_v36 = vpop.f32.mrb[3].mxu1  ;;  %v528_v37 = vmax.f32 %v402_v27, 0.0  ;;  %v405_v39 = vadd.f32 %v875_v20, %v404_v35 }
  0xea   : > { %v544_v38 = vmax.f32 %v466_v28, 0.0  ;;  %v469_v40 = vadd.f32 %v875_v20, %v468_v36  ;;  %562 = vst [vmem:[%s883_s30 + $0x10] sm:$0xff] %v530_v31  ;;  %v531_v41 = vmax.f32 %v413_v33, 0.0 }
  0xeb   : > { %578 = vst [vmem:[%s883_s30 + $0x90] sm:$0xff] %v546_v32  ;;  %v547_v42 = vmax.f32 %v477_v34, 0.0  ;;  %560 = vst [vmem:[%s883_s30] sm:$0xff] %v528_v37  ;;  %v529_v43 = vmax.f32 %v405_v39, 0.0 }
  0xec   : > { %576 = vst [vmem:[%s883_s30 + $0x80] sm:$0xff] %v544_v38  ;;  %v545_v44 = vmax.f32 %v469_v40, 0.0  ;;  %563 = vst [vmem:[%s883_s30 + $0x18] sm:$0xff] %v531_v41 }
  0xed   : > { %579 = vst [vmem:[%s883_s30 + $0x98] sm:$0xff] %v547_v42  ;;  %561 = vst [vmem:[%s883_s30 + $0x8] sm:$0xff] %v529_v43  ;;  %v726_v45 = vpop.f32.mrb[4].mxu0 }
  0xee   : > { %577 = vst [vmem:[%s883_s30 + $0x88] sm:$0xff] %v545_v44  ;;  %v742_v46 = vpop.f32.mrb[4].mxu1  ;;  %v426_v47 = vadd.f32 %v726_v45, %v875_v20  ;;  %v417_v49 = vpop.f32.mrb[5].mxu0 }
  0xef   : > { %v490_v48 = vadd.f32 %v742_v46, %v875_v20  ;;  %v481_v50 = vpop.f32.mrb[5].mxu1  ;;  %v418_v51 = vadd.f32 %v875_v20, %v417_v49  ;;  %v727_v53 = vpop.f32.mrb[6].mxu0 }
  0xf0   : > { %v482_v52 = vadd.f32 %v875_v20, %v481_v50  ;;  %v743_v54 = vpop.f32.mrb[6].mxu1  ;;  %v534_v55 = vmax.f32 %v426_v47, 0.0  ;;  %v429_v57 = vadd.f32 %v727_v53, %v875_v20  ;;  %v420_v59 = vpop.f32.mrb[7].mxu0 }
  0xf1   : > { %v550_v56 = vmax.f32 %v490_v48, 0.0  ;;  %v493_v58 = vadd.f32 %v743_v54, %v875_v20  ;;  %v484_v60 = vpop.f32.mrb[7].mxu1  ;;  %v532_v61 = vmax.f32 %v418_v51, 0.0  ;;  %v421_v63 = vadd.f32 %v875_v20, %v420_v59 }
  0xf2   : > { %v548_v62 = vmax.f32 %v482_v52, 0.0  ;;  %v485_v0 = vadd.f32 %v875_v20, %v484_v60  ;;  %566 = vst [vmem:[%s883_s30 + $0x30] sm:$0xff] %v534_v55  ;;  %v535_v1 = vmax.f32 %v429_v57, 0.0 }
  0xf3   : > { %582 = vst [vmem:[%s883_s30 + $0xb0] sm:$0xff] %v550_v56  ;;  %v551_v2 = vmax.f32 %v493_v58, 0.0  ;;  %564 = vst [vmem:[%s883_s30 + $0x20] sm:$0xff] %v532_v61  ;;  %v533_v3 = vmax.f32 %v421_v63, 0.0 }
  0xf4   : > { %580 = vst [vmem:[%s883_s30 + $0xa0] sm:$0xff] %v548_v62  ;;  %v549_v4 = vmax.f32 %v485_v0, 0.0  ;;  %567 = vst [vmem:[%s883_s30 + $0x38] sm:$0xff] %v535_v1 }
  0xf5   : > { %583 = vst [vmem:[%s883_s30 + $0xb8] sm:$0xff] %v551_v2  ;;  %565 = vst [vmem:[%s883_s30 + $0x28] sm:$0xff] %v533_v3  ;;  %v730_v5 = vpop.f32.mrb[8].mxu0 }
  0xf6   : > { %581 = vst [vmem:[%s883_s30 + $0xa8] sm:$0xff] %v549_v4  ;;  %v746_v6 = vpop.f32.mrb[8].mxu1  ;;  %v442_v7 = vadd.f32 %v730_v5, %v875_v20  ;;  %v433_v9 = vpop.f32.mrb[9].mxu0 }
  0xf7   : > { %v506_v8 = vadd.f32 %v746_v6, %v875_v20  ;;  %v497_v10 = vpop.f32.mrb[9].mxu1  ;;  %v434_v11 = vadd.f32 %v875_v20, %v433_v9  ;;  %v731_v13 = vpop.f32.mrb[10].mxu0 }
  0xf8   : > { %v498_v12 = vadd.f32 %v875_v20, %v497_v10  ;;  %v747_v14 = vpop.f32.mrb[10].mxu1  ;;  %v538_v15 = vmax.f32 %v442_v7, 0.0  ;;  %v445_v17 = vadd.f32 %v731_v13, %v875_v20  ;;  %v436_v19 = vpop.f32.mrb[11].mxu0 }
  0xf9   : > { %v554_v16 = vmax.f32 %v506_v8, 0.0  ;;  %v509_v18 = vadd.f32 %v747_v14, %v875_v20  ;;  %v500_v21 = vpop.f32.mrb[11].mxu1  ;;  %v536_v22 = vmax.f32 %v434_v11, 0.0  ;;  %v437_v24 = vadd.f32 %v875_v20, %v436_v19 }
  0xfa   : > { %v552_v23 = vmax.f32 %v498_v12, 0.0  ;;  %v501_v25 = vadd.f32 %v875_v20, %v500_v21  ;;  %570 = vst [vmem:[%s883_s30 + $0x50] sm:$0xff] %v538_v15  ;;  %v539_v26 = vmax.f32 %v445_v17, 0.0 }
  0xfb   : > { %586 = vst [vmem:[%s883_s30 + $0xd0] sm:$0xff] %v554_v16  ;;  %v555_v27 = vmax.f32 %v509_v18, 0.0  ;;  %568 = vst [vmem:[%s883_s30 + $0x40] sm:$0xff] %v536_v22  ;;  %v537_v28 = vmax.f32 %v437_v24, 0.0 }
  0xfc   : > { %584 = vst [vmem:[%s883_s30 + $0xc0] sm:$0xff] %v552_v23  ;;  %v553_v29 = vmax.f32 %v501_v25, 0.0  ;;  %571 = vst [vmem:[%s883_s30 + $0x58] sm:$0xff] %v539_v26 }
  0xfd   : > { %587 = vst [vmem:[%s883_s30 + $0xd8] sm:$0xff] %v555_v27  ;;  %569 = vst [vmem:[%s883_s30 + $0x48] sm:$0xff] %v537_v28  ;;  %v734_v30 = vpop.f32.mrb[12].mxu0 }
  0xfe   : > { %585 = vst [vmem:[%s883_s30 + $0xc8] sm:$0xff] %v553_v29  ;;  %v750_v31 = vpop.f32.mrb[12].mxu1  ;;  %v458_v32 = vadd.f32 %v734_v30, %v875_v20  ;;  %v449_v34 = vpop.f32.mrb[13].mxu0 }
  0xff   : > { %v522_v33 = vadd.f32 %v750_v31, %v875_v20  ;;  %v513_v35 = vpop.f32.mrb[13].mxu1  ;;  %v450_v36 = vadd.f32 %v875_v20, %v449_v34  ;;  %v735_v38 = vpop.f32.mrb[14].mxu0 }
 0x100   : > { %v514_v37 = vadd.f32 %v875_v20, %v513_v35  ;;  %v751_v39 = vpop.f32.mrb[14].mxu1  ;;  %v542_v40 = vmax.f32 %v458_v32, 0.0  ;;  %v461_v42 = vadd.f32 %v735_v38, %v875_v20  ;;  %v452_v44 = vpop.f32.mrb[15].mxu0 }
 0x101   : > { %v558_v41 = vmax.f32 %v522_v33, 0.0  ;;  %v525_v43 = vadd.f32 %v751_v39, %v875_v20  ;;  %v516_v45 = vpop.f32.mrb[15].mxu1  ;;  %v540_v46 = vmax.f32 %v450_v36, 0.0  ;;  %v453_v48 = vadd.f32 %v875_v20, %v452_v44 }
 0x102   : > { %v556_v47 = vmax.f32 %v514_v37, 0.0  ;;  %v517_v49 = vadd.f32 %v875_v20, %v516_v45  ;;  %574 = vst [vmem:[%s883_s30 + $0x70] sm:$0xff] %v542_v40  ;;  %v543_v50 = vmax.f32 %v461_v42, 0.0 }
 0x103   : > { %590 = vst [vmem:[%s883_s30 + $0xf0] sm:$0xff] %v558_v41  ;;  %v559_v51 = vmax.f32 %v525_v43, 0.0  ;;  %572 = vst [vmem:[%s883_s30 + $0x60] sm:$0xff] %v540_v46  ;;  %v541_v52 = vmax.f32 %v453_v48, 0.0 }
 0x104   : > { %588 = vst [vmem:[%s883_s30 + $0xe0] sm:$0xff] %v556_v47  ;;  %v557_v53 = vmax.f32 %v517_v49, 0.0  ;;  %575 = vst [vmem:[%s883_s30 + $0x78] sm:$0xff] %v543_v50 }
 0x105   : > { %591 = vst [vmem:[%s883_s30 + $0xf8] sm:$0xff] %v559_v51  ;;  %573 = vst [vmem:[%s883_s30 + $0x68] sm:$0xff] %v541_v52 }
 0x106   : > { %589 = vst [vmem:[%s883_s30 + $0xe8] sm:$0xff] %v557_v53 }
 0x107 PF: > { %s13_s12 = sadd.s32 1, %s793_s12  }
 0x108   : > { %p10_p4 = scmp.ge.s32.totalorder %s13_s12, 10  }
 0x10a   :  { %12 = sbr.rel (!%p10_p4) target bundleno = 1 (0x1), region = 62 }

</bundles_post_ra>
